<compile_context>
chip_gen: v7x
topology: tpu7x:2x2x1
jax: 0.10.0
libtpu: 0.0.40
codegen_flags: <defaults>
</compile_context>

<pallas_src>
import functools
import math

import jax
import jax.numpy as jnp
from jax.experimental import pallas as pl
from jax.experimental.pallas import tpu as pltpu


def _build_pe(d_model: int, max_len: int = 5000, dtype=jnp.float32) -> jnp.ndarray:
    """Sinusoidal positional-encoding table, shape (max_len, d_model).

    Same values as the PyTorch buffer (stored there as (max_len, 1, d_model));
    the batch axis is re-introduced by broadcasting inside the kernel.
    Build it ONCE in the model dtype so the forward path never pays a per-call
    cast of the whole (max_len, d_model) table.
    """
    position = jnp.arange(0, max_len, dtype=jnp.float32)[:, None]            # (max_len, 1)
    div_term = jnp.exp(
        jnp.arange(0, d_model, 2, dtype=jnp.float32) * (-math.log(10000.0) / d_model)
    )
    angles = position * div_term                                              # (max_len, ceil(d/2))
    pe = jnp.zeros((max_len, d_model), dtype=jnp.float32)
    pe = pe.at[:, 0::2].set(jnp.sin(angles))
    pe = pe.at[:, 1::2].set(jnp.cos(angles[:, : (d_model // 2)]) if d_model % 2
                            else jnp.cos(angles))
    return pe.astype(dtype)


def _pe_add_kernel(x_ref, pe_ref, o_ref, *, batch: int, d_model: int):
    # x_ref / o_ref: (TS, B*D) lane-dense tiles; pe_ref: (TS, D) tile of the table.
    # Per-batch static lane-group slices instead of a concat: no (TS, B*D)
    # temporary, and each store is a D-wide slab (128-aligned, unmasked when
    # D % 128 == 0).
    pe = pe_ref[...]
    if batch == 1:
        o_ref[...] = x_ref[...] + pe
    else:
        for b in range(batch):                         # static, small loop
            sl = slice(b * d_model, (b + 1) * d_model)
            o_ref[:, sl] = x_ref[:, sl] + pe
    # TODO(synk): for batch <= 2 the pe stream (~20-33% of HBM traffic) could be
    # synthesized in-kernel on the idle EUP (sin/cos of broadcasted_iota row ids
    # offset by pl.program_id(0)*TS) instead of being DMA'd at all.


def _round_down8(n: int) -> int:
    return max(8, (n // 8) * 8)


def _round_up8(n: int) -> int:
    return ((n + 7) // 8) * 8


def positional_encoding_forward(x: jnp.ndarray, pe_table: jnp.ndarray,
                                *, tile_s: int | None = None,
                                donate_x: bool = False) -> jnp.ndarray:
    """x: (S, B, D); pe_table: (max_len, D), ideally already in x.dtype.

    Returns x + pe_table[:S][:, None, :].
    """
    S, B, D = x.shape
    if pe_table.shape[0] < S:
        raise ValueError("pe_table max_len is smaller than the sequence length")

    if pe_table.dtype != x.dtype:
        # Fallback only: cast just the rows we need. Prefer building the table in
        # the model dtype (see _build_pe) so this never runs in the hot path.
        pe_table = pe_table[:S].astype(x.dtype)

    # Collapse (B, D) -> B*D: free row-major reshape, output block's last dim is
    # lane-dense (a multiple of 128 whenever D is) -> unmasked stores.
    x2 = x.reshape(S, B * D)

    itemsize = jnp.dtype(x.dtype).itemsize
    x_row_bytes = B * D * itemsize
    pe_row_bytes = D * itemsize

    if tile_s is None:
        TARGET_TILE_BYTES = 4 * 1024 * 1024   # ~4 MiB x-tiles (keeps the ~0.35 us/step
                                              # overhead <10% even at v7x's 3.2 TB/s HBM)
        VMEM_BUDGET = 24 * 1024 * 1024        # 2x(x+out+pe) double-buffered, headroom
                                              # under the explicit 32 MiB limit below
        ts = max(1, TARGET_TILE_BYTES // x_row_bytes)
        ts = min(ts, max(1, VMEM_BUDGET // (2 * (2 * x_row_bytes + pe_row_bytes))))
        ts = _round_down8(ts)
        ts = min(ts, _round_up8(S))           # no block meaningfully larger than S
        # v7x megacore: keep >= 2 (ideally 4) grid steps when S allows so the
        # "parallel" axis actually spreads tiles across both TensorCores.
        max_tiles = -(-S // 8)
        want_tiles = min(4, max_tiles)
        if want_tiles > 1:
            ts = min(ts, _round_down8(S // want_tiles))
    else:
        ts = _round_down8(int(tile_s))
    # ts is always a multiple of 8, so the pe block (ts, D) satisfies the (8,128)
    # rule for ANY S (the trailing grid block is partial/masked instead of ever
    # collapsing to a ts == S block).
    # TODO(synk): for very large B*D add a second grid axis over the lane dim
    # (multiples of 128) so the minimum 8-row tile stays under v7x's 64 MiB VMEM.

    grid = (pl.cdiv(S, ts),)

    out2 = pl.pallas_call(
        functools.partial(_pe_add_kernel, batch=B, d_model=D),
        out_shape=jax.ShapeDtypeStruct((S, B * D), x.dtype),
        grid=grid,
        in_specs=[
            pl.BlockSpec((ts, B * D), lambda i: (i, 0)),  # x tile
            pl.BlockSpec((ts, D), lambda i: (i, 0)),      # matching pe rows, straight from the table
        ],
        out_specs=pl.BlockSpec((ts, B * D), lambda i: (i, 0)),
        compiler_params=pltpu.CompilerParams(
            dimension_semantics=("parallel",),            # shard S-tiles across TCs on v7x
            vmem_limit_bytes=32 * 1024 * 1024,
        ),
        input_output_aliases=({0: 0} if donate_x else {}),  # optional footprint win
    )(x2, pe_table)

    return out2.reshape(S, B, D)


if __name__ == "__main__":
    d_model = 128      # multiple of 128 -> lane-dense tiles
    max_len = 256      # small table for the synthetic test (module default is 5000)

    key = jax.random.PRNGKey(0)
    k1, k2, k3 = jax.random.split(key, 3)

    # Built once, already in the model dtype -> no per-call cast pass.
    pe = _build_pe(d_model, max_len, dtype=jnp.float32)

    # Case 1: batch=2, auto tiling (heuristic picks ts=8 -> 2-step parallel grid).
    S1, B1 = 16, 2
    x1 = jax.random.normal(k1, (S1, B1, d_model), dtype=jnp.float32)
    out1 = jax.block_until_ready(positional_encoding_forward(x1, pe))
    ref1 = x1 + pe[:S1][:, None, :]
    assert out1.shape == (S1, B1, d_model)
    assert jnp.allclose(out1, ref1, atol=1e-6), "mismatch vs reference (case 1)"

    # Case 2: S not a multiple of the tile -> partial trailing block (S % 8 != 0).
    S2, B2 = 12, 2
    x2 = jax.random.normal(k2, (S2, B2, d_model), dtype=jnp.float32)
    out2 = jax.block_until_ready(positional_encoding_forward(x2, pe, tile_s=8))
    ref2 = x2 + pe[:S2][:, None, :]
    assert out2.shape == (S2, B2, d_model)
    assert jnp.allclose(out2, ref2, atol=1e-6), "mismatch vs reference (case 2)"

    # Case 3: batch=1 fast path, longer sequence, auto tiling (>= 4 grid steps).
    S3, B3 = 40, 1
    x3 = jax.random.normal(k3, (S3, B3, d_model), dtype=jnp.float32)
    out3 = jax.block_until_ready(positional_encoding_forward(x3, pe))
    ref3 = x3 + pe[:S3][:, None, :]
    assert out3.shape == (S3, B3, d_model)
    assert jnp.allclose(out3, ref3, atol=1e-6), "mismatch vs reference (case 3)"

    print("KERNEL_OK")
</pallas_src>

<mosaic_0001>
module attributes {stable_mosaic.version = 11 : i64} {
  func.func @_pe_add_kernel(%arg0: i32, %arg1: memref<8x256xf32, #tpu.memory_space<vmem>>, %arg2: memref<8x128xf32, #tpu.memory_space<vmem>>, %arg3: memref<8x256xf32, #tpu.memory_space<vmem>>) attributes {dimension_semantics = [#tpu.dimension_semantics<parallel>], iteration_bounds = array<i64: 2>, scalar_prefetch = 0 : i64, scratch_operands = 0 : i64, tpu.core_type = #tpu.core_type<tc>, window_params = [{transform_indices = @transform_0, window_bounds = array<i64: 8, 256>}, {transform_indices = @transform_1, window_bounds = array<i64: 8, 128>}, {transform_indices = @transform_2, window_bounds = array<i64: 8, 256>}]} {
    %c0 = arith.constant 0 : index
    %c0_0 = arith.constant 0 : index
    %0 = vector.load %arg2[%c0, %c0_0] : memref<8x128xf32, #tpu.memory_space<vmem>>, vector<8x128xf32>
    %c0_1 = arith.constant 0 : index
    %c0_2 = arith.constant 0 : index
    %1 = vector.load %arg1[%c0_1, %c0_2] : memref<8x256xf32, #tpu.memory_space<vmem>>, vector<8x128xf32>
    %2 = arith.addf %1, %0 : vector<8x128xf32>
    %c0_3 = arith.constant 0 : index
    %c0_4 = arith.constant 0 : index
    %3 = vector.load %arg3[%c0_3, %c0_4] : memref<8x256xf32, #tpu.memory_space<vmem>>, vector<8x128xf32>
    tpu.vector_store %arg3[%c0_3, %c0_4], %2 {strides = array<i32>} : memref<8x256xf32, #tpu.memory_space<vmem>>, vector<8x128xf32>,
    %c0_5 = arith.constant 0 : index
    %c128 = arith.constant 128 : index
    %4 = vector.load %arg1[%c0_5, %c128] : memref<8x256xf32, #tpu.memory_space<vmem>>, vector<8x128xf32>
    %5 = arith.addf %4, %0 : vector<8x128xf32>
    %c0_6 = arith.constant 0 : index
    %c128_7 = arith.constant 128 : index
    %6 = vector.load %arg3[%c0_6, %c128_7] : memref<8x256xf32, #tpu.memory_space<vmem>>, vector<8x128xf32>
    tpu.vector_store %arg3[%c0_6, %c128_7], %5 {strides = array<i32>} : memref<8x256xf32, #tpu.memory_space<vmem>>, vector<8x128xf32>,
    return
  }
  func.func @transform_0(%arg0: i32) -> (i32, i32) {
    %c0_i32 = arith.constant 0 : i32
    %c0_i32_0 = arith.constant 0 : i32
    return %arg0, %c0_i32 : i32, i32
  }
  func.func @transform_1(%arg0: i32) -> (i32, i32) {
    %c0_i32 = arith.constant 0 : i32
    %c0_i32_0 = arith.constant 0 : i32
    return %arg0, %c0_i32 : i32, i32
  }
  func.func @transform_2(%arg0: i32) -> (i32, i32) {
    %c0_i32 = arith.constant 0 : i32
    %c0_i32_0 = arith.constant 0 : i32
    return %arg0, %c0_i32 : i32, i32
  }
}

</mosaic_0001>

<bundles_post_ra>
// kernel: tpu_custom_call.1
= control target key start
LH: loop header
LB: loop body
LE: loop exit
PB: predicated region body
PF: predicated region fallthrough
CT: control target
= control target key end

     0   :  { %7 = vsyncpa [#allocation3], 0  ;;  %s736_s0 = inlined_call_operand.hbm [shape: f32[16,256], index: 0, kind: input, shape index: {}]   ;;  %s737_s1 = inlined_call_operand.hbm [shape: f32[256,128], index: 1, kind: input, shape index: {}]   ;;  %s738_s2 = inlined_call_operand.hbm [shape: f32[16,256], index: 2, kind: output, shape index: {}]  }
   0x1   :  { %9 = vsyncpa [#allocation3 + $0x1], 0 }
   0x2   :  { %10 = vsyncpa [#allocation6], 0 }
   0x3   :  { %12 = vsyncpa [#allocation6 + $0x1], 0 }
   0x4   :  { %13 = vsyncpa [#allocation4], 0 }
   0x5   :  { %15 = vsyncpa [#allocation4 + $0x1], 0  ;;  %s532_s9 = smov 0   ;;  %s534_s10 = smov 0  }
   0x6   :  { %s536_s11 = smov 0   ;;  %s538_s12 = smov 0  }
   0x7 LB: > { %s553_s13 = sadd.s32 4294967295, %s512_s12   ;;  %s312_s14 = sadd.s32 4294967294, %s512_s12   ;;  %s512_s12 = sphi %s538_s12, %s757_s12   ;;  %s508_s11 = sphi %s536_s11, %s756_s11   ;;  %s504_s10 = sphi %s534_s10, %s755_s10   ;;  %s500_s9 = sphi %s532_s9, %s754_s9  }
   0x8   : > { %s557_s15 = sadd.s32 1, %s512_s12   ;;  %s28_s16 = sadd.s32 1, %s508_s11 }
   0x9   : > { %s25_s17 = ssub.s32 %s512_s12, %s557_s15  ;;  %p35_p0 = scmp.ne.s32.totalorder %s508_s11, %s504_s10 }
   0xa   : > { %p26_p1 = scmp.eq.s32.totalorder %s25_s17, 0  ;;  %p36_p2 = scmp.eq.s32.totalorder %s512_s12, 0 }
   0xb   : > { %p41_p3 = scmp.ne.s32.totalorder %s504_s10, %s500_s9  ;;  %p42_p4 = scmp.eq.s32.totalorder %s553_s13, 0 }
   0xc   : > { %s569_s18 = scalar_select %p26_p1, %s508_s11, %s28_s16  }
   0xd   : > { %p571_p5 = por %p36_p2, %p35_p0  ;;  %p575_p6 = por %p42_p4, %p41_p3 }
   0xe   : > { %p91_p7 = scmp.eq.s32.totalorder %s553_s13, 1  ;;  %p97_p8 = scmp.eq.s32.totalorder %s312_s14, 1 }
   0xf   : > { %s742_s20 = scalar_select %p575_p6, 1, 0 }
  0x10   : > { %p348_p10 = scmp.lt.s32.totalorder %s512_s12, 2  ;;  %p582_p11 = por %p91_p7, %p35_p0 }
  0x11   : > { %p586_p12 = por %p97_p8, %p41_p3  ;;  %s591_s23 = sand.u32 1, %s508_s11  }
  0x12   : > { %s743_s21 = scalar_select %p582_p11, 1, 0 }
  0x13   : > { %s744_s22 = scalar_select %p586_p12, 1, 0 }
  0x14   : > { %s329_s24 = sshll.u32 %s512_s12, 8  ;;  %s315_s25 = sshll.u32 %s591_s23, 4 }
  0x15   : > { %s598_s28 = scalar_lea.hbm %s736_s0, %s329_s24  ;;  %s121_s29 = scalar_lea.vmem [#allocation2], %s315_s25 }
  0x16   : > { %s129_s30 = sshll.u32 %s121_s29, 4  ;;  %p602_p13 = pnand %p348_p10, %p571_p5  ;;  %s606_s30 = int_to_ptr.vmem [resolvable:$true] %s129_s30 }
  0x17   : > { %s118_s4 = scalar_lea.sflag [#allocation3], %s591_s23  ;;  %s382_s5 = scalar_lea.hbm %s598_s28, 256 }
  0x18   : > { %p383_p2 = scmp.ne.s32.totalorder %s598_s28, %s382_s5  ;;  %p384_p3 = pneg %p602_p13 }
  0x19   : > { %s387_s8 = scalar_lea.hbm %s736_s0, 512  ;;  %p388_p5 = scmp.lt.u32.totalorder %s598_s28, %s736_s0 }
  0x1a   : > { %p385_p4 = pnand %p384_p3, %p383_p2  ;;  %p389_p8 = scmp.lt.u32.totalorder %s387_s8, %s382_s5 }
  0x1b   : > { %p391_p9 = scmp.lt.u32.totalorder %s382_s5, %s598_s28 }
  0x1c   : > { %p386_p7 = pneg %p385_p4  ;;  %p390_p10 = por %p389_p8, %p388_p5 }
  0x1e   : > { %p392_p0 = por %p391_p9, %p390_p10 }
  0x20   : > { %p393_p1 = pnand %p392_p0, %p386_p7 }
  0x22   : > { %396 = shalt.err (!%p393_p1)
}
  0x23   : > { %s397_s17 = scalar_lea.vmem %s606_s30, 256  ;;  %s514_s19 = smov [#allocation2]  }
  0x24   : > { %p398_p2 = scmp.ne.s32.totalorder %s606_s30, %s397_s17  ;;  %s402_s24 = sshll.u32 %s514_s19, 4  ;;  %s403_s24 = int_to_ptr.vmem [resolvable:$false] %s402_s24 }
  0x25   : > { %s404_s25 = scalar_lea.vmem %s403_s24, 512  ;;  %p405_p11 = scmp.lt.s32.totalorder %s606_s30, %s403_s24 }
  0x26   : > { %p400_p4 = pnand %p398_p2, %p384_p3  ;;  %p406_p5 = scmp.lt.s32.totalorder %s404_s25, %s397_s17 }
  0x28   : > { %p401_p12 = pneg %p400_p4  ;;  %p407_p8 = por %p406_p5, %p405_p11 }
  0x2a   : > { %p408_p9 = pnand %p407_p8, %p401_p12 }
  0x2c   : > { %411 = shalt.err (!%p408_p9)
}
  0x2d   : > { %340 = dma.hbm_to_vmem [thread:$0]  (!%p602_p13), %s598_s28, 256, %s606_s30, %s118_s4  }
  0x2e   : > { %p746_p0 = scmp.lt.s32.totalorder %s512_s12, 3  ;;  %p747_p1 = scmp.ge.s32.totalorder %s512_s12, 1 }
  0x2f   : > { %s318_s27 = sshll.u32 %s591_s23, 3  ;;  %s319_s29 = sshll.u32 %s512_s12, 7 }
  0x30   : > { %p640_p7 = pnand %p747_p1, %p746_p0  ;;  %s649_s7 = scalar_lea.hbm %s737_s1, %s319_s29 }
  0x31   : > { %s140_s8 = scalar_lea.vmem [#allocation5], %s318_s27  ;;  %s137_s28 = scalar_lea.sflag [#allocation6], %s591_s23 }
  0x32   : > { %s748_s26 = scalar_select %p640_p7, 1, 0 }
  0x33   : > { %s147_s14 = sshll.u32 %s140_s8, 4  ;;  %s412_s30 = scalar_lea.hbm %s649_s7, 128  ;;  %s148_s14 = int_to_ptr.vmem [resolvable:$true] %s147_s14 }
  0x34   : > { %p413_p11 = scmp.ne.s32.totalorder %s649_s7, %s412_s30  ;;  %s417_s17 = scalar_lea.hbm %s737_s1, 4096 }
  0x35   : > { %p418_p2 = scmp.lt.u32.totalorder %s649_s7, %s737_s1  ;;  %p419_p4 = scmp.lt.u32.totalorder %s417_s17, %s412_s30 }
  0x36   : > { %p415_p12 = pnand %p413_p11, %p384_p3  ;;  %p421_p8 = scmp.lt.u32.totalorder %s412_s30, %s649_s7 }
  0x37   : > { %p420_p5 = por %p419_p4, %p418_p2 }
  0x38   : > { %p416_p10 = pneg %p415_p12 }
  0x39   : > { %p422_p9 = por %p421_p8, %p420_p5 }
  0x3b   : > { %p423_p0 = pnand %p422_p9, %p416_p10 }
  0x3d   : > { %426 = shalt.err (!%p423_p0)
}
  0x3e   : > { %s427_s23 = scalar_lea.vmem %s148_s14, 128  ;;  %s515_s25 = smov [#allocation5]  }
  0x3f   : > { %p428_p1 = scmp.ne.s32.totalorder %s148_s14, %s427_s23  ;;  %s432_s27 = sshll.u32 %s515_s25, 4  ;;  %s433_s27 = int_to_ptr.vmem [resolvable:$false] %s432_s27 }
  0x40   : > { %s434_s29 = scalar_lea.vmem %s433_s27, 256  ;;  %p435_p6 = scmp.lt.s32.totalorder %s148_s14, %s433_s27 }
  0x41   : > { %p430_p11 = pnand %p428_p1, %p384_p3  ;;  %p436_p7 = scmp.lt.s32.totalorder %s434_s29, %s427_s23 }
  0x43   : > { %p431_p12 = pneg %p430_p11  ;;  %p437_p2 = por %p436_p7, %p435_p6 }
  0x45   : > { %p438_p4 = pnand %p437_p2, %p431_p12 }
  0x47   : > { %441 = shalt.err (!%p438_p4)
}
  0x48   : > { %343 = dma.hbm_to_vmem [thread:$0]  (!%p602_p13), %s649_s7, 128, %s148_s14, %s137_s28  }
  0x49   : > { %p749_p10 = scmp.ne.s32.totalorder %s748_s26, 0 }
  0x4a   : > { %s674_s5 = sand.u32 (!%p749_p10), 1, %s504_s10   ;;  %p750_p3 = scmp.ne.s32.totalorder (!%p749_p10), %s742_s20, 0 }
  0x4b   : > { %156 = sbr.rel (%p749_p10) target bundleno = 112 (0x70), region = 28  ;;  %s321_s6 = sshll.u32 (!%p749_p10), %s674_s5, 4 }
  0x4c   : > { %s159_s8 = scalar_lea.sflag (!%p749_p10), [#allocation3], %s674_s5  ;;  %s162_s30 = scalar_lea.vmem (!%p749_p10), [#allocation2], %s321_s6 }
  0x52   : > { %487 = dma.done.wait (%p750_p3), %s159_s8, 256  }
  0x53   : > { %489 = vsyncadd (%p750_p3), %s159_s8, 4294967040  ;;  %s322_s3 = sshll.u32 %s674_s5, 3  ;;  %s168_s26 = scalar_lea.sflag [#allocation6], %s674_s5 }
  0x54   : > { %s171_s7 = scalar_lea.vmem [#allocation5], %s322_s3 }
  0x55   : > { %491 = dma.done.wait (%p750_p3), %s168_s26, 128  }
  0x56   : > { %493 = vsyncadd (%p750_p3), %s168_s26, 4294967168  ;;  %s196_s14 = scalar_lea.vmem [#allocation7], %s321_s6  ;;  %s330_s4 = sshll.u32 %s553_s13, 8  ;;  %v197_v0 = vld [vmem:[%s171_s7] sm:$0xff]  ;;  %v201_v2 = vld [vmem:[%s162_s30 + $0x8] sm:$0xff] }
  0x57   : > { %s219_s28 = sshll.u32 %s196_s14, 4  ;;  %v198_v1 = vld [vmem:[%s162_s30] sm:$0xff]  ;;  %v202_v4 = vadd.f32 %v201_v2, %v197_v0  ;;  %s694_s20 = scalar_lea.hbm %s738_s2, %s330_s4  ;;  %s689_s28 = int_to_ptr.vmem [resolvable:$true] %s219_s28 }
  0x58   : > { %v199_v3 = vadd.f32 %v198_v1, %v197_v0  ;;  %s205_s19 = scalar_lea.sflag [#allocation4], %s674_s5  ;;  %s442_s24 = scalar_lea.vmem %s689_s28, 256 }
  0x59   : > { %203 = vst [vmem:[%s196_s14 + $0x8] sm:$0xff] %v202_v4  ;;  %p443_p6 = scmp.ne.s32.totalorder %s689_s28, %s442_s24  ;;  %p751_p13 = scmp.ne.s32.totalorder %s743_s21, 0 }
  0x5a   : > { %200 = vst [vmem:[%s196_s14] sm:$0xff] %v199_v3  ;;  %s516_s13 = smov [#allocation7]  }
  0x5b   : > { %p444_p7 = pnand %p443_p6, %p751_p13  ;;  %s446_s23 = sshll.u32 %s516_s13, 4  ;;  %s447_s23 = int_to_ptr.vmem [resolvable:$false] %s446_s23 }
  0x5c   : > { %s448_s25 = scalar_lea.vmem %s447_s23, 512  ;;  %p449_p8 = scmp.lt.s32.totalorder %s689_s28, %s447_s23 }
  0x5d   : > { %p445_p5 = pneg %p444_p7  ;;  %p450_p9 = scmp.lt.s32.totalorder %s448_s25, %s442_s24 }
  0x5f   : > { %p451_p0 = por %p450_p9, %p449_p8 }
  0x61   : > { %p452_p1 = pnand %p451_p0, %p445_p5 }
  0x63   : > { %455 = shalt.err (!%p452_p1)
}
  0x64   : > { %s456_s27 = scalar_lea.hbm %s694_s20, 256  ;;  %s460_s6 = scalar_lea.hbm %s738_s2, 512 }
  0x65   : > { %p457_p11 = scmp.ne.s32.totalorder %s694_s20, %s456_s27  ;;  %p461_p4 = scmp.lt.u32.totalorder %s694_s20, %s738_s2 }
  0x66   : > { %p462_p10 = scmp.lt.u32.totalorder %s460_s6, %s456_s27  ;;  %p464_p6 = scmp.lt.u32.totalorder %s456_s27, %s694_s20 }
  0x67   : > { %p458_p12 = pnand %p457_p11, %p751_p13 }
  0x68   : > { %p463_p3 = por %p462_p10, %p461_p4 }
  0x69   : > { %p459_p2 = pneg %p458_p12 }
  0x6a   : > { %p465_p7 = por %p464_p6, %p463_p3 }
  0x6c   : > { %p466_p5 = pnand %p465_p7, %p459_p2 }
  0x6e   : > { %469 = shalt.err (!%p466_p5)
}
  0x6f   : > { %335 = dma.vmem_to_hbm [thread:$0]  (%p751_p13), %s689_s28, 256, %s694_s20, %s205_s19  }
  0x70 PF: > { %s231_s3 = sand.u32 1, %s500_s9   ;;  %p752_p8 = scmp.ne.s32.totalorder %s744_s22, 0 }
  0x71   : > { %p753_p9 = scmp.ge.s32.totalorder %s512_s12, 2  ;;  %s232_s26 = scalar_lea.sflag [#allocation4], %s231_s3 }
  0x73   : > { %p345_p0 = pnand %p753_p9, %p752_p8 }
  0x75   : > { %495 = dma.done.wait (!%p345_p0), %s232_s26, 256  }
  0x76   : > { %497 = vsyncadd (!%p345_p0), %s232_s26, 4294967040  ;;  %p18_p1 = scmp.ge.s32.totalorder %s557_s15, 4   ;;  %s754_s9 = smov %s504_s10 }
  0x77   : > { %s755_s10 = smov %s508_s11  ;;  %s756_s11 = smov %s569_s18 }
  0x78   : > { %s757_s12 = smov %s557_s15  ;;  %20 = sbr.rel (!%p18_p1) target bundleno = 7 (0x7), region = 86 }
  0x7f   :  { %237 = vsyncpa [#allocation3], 1 }
  0x80   :  { %239 = vsyncpa [#allocation3 + $0x1], 1 }
  0x81   :  { %240 = vsyncpa [#allocation6], 1 }
  0x82   :  { %242 = vsyncpa [#allocation6 + $0x1], 1 }
  0x83   :  { %243 = vsyncpa [#allocation4], 1 }
  0x84   :  { %245 = vsyncpa [#allocation4 + $0x1], 1 }

</bundles_post_ra>
